<compile_context>
chip_gen: v6e
topology: v6e:2x2x1
jax: 0.10.0
libtpu: 0.0.40
codegen_flags: <defaults>
</compile_context>

<pallas_src>
import jax
import jax.numpy as jnp
from jax.experimental import pallas as pl
from jax.experimental.pallas import tpu as pltpu


def _round_up(x: int, m: int) -> int:
    return (x + m - 1) // m * m


def _min_sublanes(dtype) -> int:
    # Minimum second-minor tile per dtype packing (f32:8, bf16:16, int8/fp8:32).
    return {4: 8, 2: 16, 1: 32}[jnp.dtype(dtype).itemsize]


# Conservative VMEM budget for keeping the table resident (double-buffered by
# the pipeline) across v5e/v6e (128 MiB) and v7x (64 MiB).
_RESIDENT_TABLE_BYTES = 12 * 1024 * 1024


def _make_resident_kernel(tok_block: int, group: int):
    """Table lives in VMEM; gather rows with dynamic sublane indexing."""

    def kernel(idx_ref, w_ref, o_ref):
        # idx_ref: SMEM (n_total,) int32   (scalar-prefetched token ids)
        # w_ref:   VMEM (V_pad, dim_pad)   (whole table, resident across grid)
        # o_ref:   VMEM (tok_block, dim_pad)
        base = pl.program_id(0) * tok_block
        for g in range(tok_block // group):
            rows = [
                w_ref[pl.ds(idx_ref[base + g * group + k], 1), :]
                for k in range(group)
            ]
            # One dense, full-sublane store per group (not 1-row masked stores).
            o_ref[pl.ds(g * group, group), :] = jnp.concatenate(rows, axis=0)

    return kernel


def _make_rowdma_kernel(tok_block: int):
    """Table stays in HBM; DMA rows directly into the output tile."""

    def kernel(idx_ref, w_hbm, o_ref, sems):
        # idx_ref: SMEM (n_total,) int32
        # w_hbm:   ANY/HBM (V, dim)
        # o_ref:   VMEM (tok_block, dim)
        # sems:    DMA semaphores (tok_block,)
        base = pl.program_id(0) * tok_block
        copies = []
        for k in range(tok_block):
            row = idx_ref[base + k]
            copies.append(
                pltpu.make_async_copy(
                    w_hbm.at[pl.ds(row, 1), :],
                    o_ref.at[pl.ds(k, 1), :],
                    sems.at[k],
                )
            )
        for c in copies:   # many row DMAs in flight at once
            c.start()
        for c in copies:
            c.wait()

    return kernel


def embedding_forward(indices: jnp.ndarray,
                      weight: jnp.ndarray,
                      *,
                      tok_block: int | None = None,
                      force_row_dma: bool = False) -> jnp.ndarray:
    """Equivalent of PyTorch Embedding.forward: returns weight[indices]."""
    num_embeddings, dim = weight.shape
    out_struct_shape = tuple(indices.shape) + (dim,)

    sub = _min_sublanes(weight.dtype)

    flat_idx = indices.reshape(-1).astype(jnp.int32)
    # PyTorch raises on out-of-range ids; clamp defensively so no OOB DMA/load.
    flat_idx = jnp.clip(flat_idx, 0, num_embeddings - 1)
    n_tok = flat_idx.shape[0]

    if tok_block is None:
        # Big enough to amortize the ~0.35us/step overhead, small enough to
        # keep >= 2 grid steps for short sequences (v7x has 2 TensorCores).
        tok_block = max(sub, min(128, _round_up(max(1, n_tok // 2), sub)))
    tok_block = _round_up(tok_block, sub)

    n_total = _round_up(n_tok, tok_block)
    if n_total != n_tok:
        flat_idx = jnp.concatenate(
            [flat_idx, jnp.zeros((n_total - n_tok,), jnp.int32)])
    n_blocks = n_total // tok_block

    dim_p = _round_up(dim, 128)                 # lane-dense output blocks
    v_pad = _round_up(num_embeddings, sub)
    table_bytes = v_pad * dim_p * jnp.dtype(weight.dtype).itemsize

    use_resident = (not force_row_dma) and table_bytes <= _RESIDENT_TABLE_BYTES

    if use_resident:
        w = weight
        if v_pad != num_embeddings or dim_p != dim:
            w = jnp.pad(weight,
                        ((0, v_pad - num_embeddings), (0, dim_p - dim)))
        flat_out = pl.pallas_call(
            _make_resident_kernel(tok_block, sub),
            out_shape=jax.ShapeDtypeStruct((n_total, dim_p), weight.dtype),
            grid_spec=pltpu.PrefetchScalarGridSpec(
                num_scalar_prefetch=1,        # token ids land in SMEM
                grid=(n_blocks,),
                in_specs=[
                    # Whole table as one block with a constant index_map: it is
                    # DMA'd once and stays VMEM-resident across all grid steps.
                    pl.BlockSpec((v_pad, dim_p), lambda i, idx: (0, 0)),
                ],
                out_specs=pl.BlockSpec((tok_block, dim_p),
                                       lambda i, idx: (i, 0)),
            ),
            compiler_params=pltpu.CompilerParams(
                dimension_semantics=("parallel",),
                vmem_limit_bytes=40 * 1024 * 1024,
            ),
        )(flat_idx, w)
        if dim_p != dim:
            flat_out = flat_out[:, :dim]
    else:
        flat_out = pl.pallas_call(
            _make_rowdma_kernel(tok_block),
            out_shape=jax.ShapeDtypeStruct((n_total, dim), weight.dtype),
            grid_spec=pltpu.PrefetchScalarGridSpec(
                num_scalar_prefetch=1,
                grid=(n_blocks,),
                in_specs=[pl.BlockSpec(memory_space=pl.ANY)],  # table in HBM
                out_specs=pl.BlockSpec((tok_block, dim),
                                       lambda i, idx: (i, 0)),
                scratch_shapes=[pltpu.SemaphoreType.DMA((tok_block,))],
            ),
            compiler_params=pltpu.CompilerParams(
                dimension_semantics=("parallel",),
            ),
        )(flat_idx, weight)

    if n_total != n_tok:
        flat_out = flat_out[:n_tok]
    # TODO(synk): when padding was added, the slices above cost one extra XLA
    # copy; a masked/BoundedSlice last block would avoid it.
    return flat_out.reshape(out_struct_shape)


if __name__ == "__main__":
    num_embeddings = 10
    embedding_dim = 32
    batch, seq_len = 2, 8

    key = jax.random.PRNGKey(0)
    k_w, k_x = jax.random.split(key)
    weight = jax.random.normal(
        k_w, (num_embeddings, embedding_dim), dtype=jnp.float32)
    x = jax.random.randint(
        k_x, (batch, seq_len), 0, num_embeddings, dtype=jnp.int32)

    ref = weight[x]   # plain-JAX reference, same semantics as PyTorch forward

    # Primary (VMEM-resident) path.
    out = jax.block_until_ready(embedding_forward(x, weight))
    assert out.shape == (batch, seq_len, embedding_dim)
    assert out.dtype == weight.dtype
    assert jnp.array_equal(out, ref), "resident-path mismatch vs reference"

    # Also exercise the large-table (HBM row-DMA) path on the same inputs.
    out_dma = jax.block_until_ready(
        embedding_forward(x, weight, force_row_dma=True))
    assert jnp.array_equal(out_dma, ref), "row-DMA-path mismatch vs reference"

    print("KERNEL_OK")
</pallas_src>

<mosaic_0001>
module attributes {stable_mosaic.version = 11 : i64} {
  func.func @kernel(%arg0: i32, %arg1: memref<16xi32, #tpu.memory_space<smem>>, %arg2: memref<16x128xf32, #tpu.memory_space<vmem>>, %arg3: memref<8x128xf32, #tpu.memory_space<vmem>>) attributes {dimension_semantics = [#tpu.dimension_semantics<parallel>], iteration_bounds = array<i64: 2>, scalar_prefetch = 1 : i64, scratch_operands = 0 : i64, tpu.core_type = #tpu.core_type<tc>, window_params = [{pipeline_mode = #tpu.pipeline_mode<synchronous>, transform_indices = @transform_0, window_bounds = array<i64: 16, 128>}, {transform_indices = @transform_1, window_bounds = array<i64: 8, 128>}]} {
    %c8_i32 = arith.constant 8 : i32
    %0 = arith.muli %arg0, %c8_i32 : i32
    %c0_i32 = arith.constant 0 : i32
    %1 = arith.addi %0, %c0_i32 : i32
    %c0_i32_0 = arith.constant 0 : i32
    %2 = arith.addi %1, %c0_i32_0 : i32
    %3 = arith.index_cast %2 : i32 to index
    %4 = memref.load %arg1[%3] : memref<16xi32, #tpu.memory_space<smem>>
    %5 = arith.index_cast %4 : i32 to index
    %c0 = arith.constant 0 : index
    %6 = vector.load %arg2[%5, %c0] : memref<16x128xf32, #tpu.memory_space<vmem>>, vector<1x128xf32>
    %c0_i32_1 = arith.constant 0 : i32
    %7 = arith.addi %0, %c0_i32_1 : i32
    %c1_i32 = arith.constant 1 : i32
    %8 = arith.addi %7, %c1_i32 : i32
    %9 = arith.index_cast %8 : i32 to index
    %10 = memref.load %arg1[%9] : memref<16xi32, #tpu.memory_space<smem>>
    %11 = arith.index_cast %10 : i32 to index
    %c0_2 = arith.constant 0 : index
    %12 = vector.load %arg2[%11, %c0_2] : memref<16x128xf32, #tpu.memory_space<vmem>>, vector<1x128xf32>
    %c0_i32_3 = arith.constant 0 : i32
    %13 = arith.addi %0, %c0_i32_3 : i32
    %c2_i32 = arith.constant 2 : i32
    %14 = arith.addi %13, %c2_i32 : i32
    %15 = arith.index_cast %14 : i32 to index
    %16 = memref.load %arg1[%15] : memref<16xi32, #tpu.memory_space<smem>>
    %17 = arith.index_cast %16 : i32 to index
    %c0_4 = arith.constant 0 : index
    %18 = vector.load %arg2[%17, %c0_4] : memref<16x128xf32, #tpu.memory_space<vmem>>, vector<1x128xf32>
    %c0_i32_5 = arith.constant 0 : i32
    %19 = arith.addi %0, %c0_i32_5 : i32
    %c3_i32 = arith.constant 3 : i32
    %20 = arith.addi %19, %c3_i32 : i32
    %21 = arith.index_cast %20 : i32 to index
    %22 = memref.load %arg1[%21] : memref<16xi32, #tpu.memory_space<smem>>
    %23 = arith.index_cast %22 : i32 to index
    %c0_6 = arith.constant 0 : index
    %24 = vector.load %arg2[%23, %c0_6] : memref<16x128xf32, #tpu.memory_space<vmem>>, vector<1x128xf32>
    %c0_i32_7 = arith.constant 0 : i32
    %25 = arith.addi %0, %c0_i32_7 : i32
    %c4_i32 = arith.constant 4 : i32
    %26 = arith.addi %25, %c4_i32 : i32
    %27 = arith.index_cast %26 : i32 to index
    %28 = memref.load %arg1[%27] : memref<16xi32, #tpu.memory_space<smem>>
    %29 = arith.index_cast %28 : i32 to index
    %c0_8 = arith.constant 0 : index
    %30 = vector.load %arg2[%29, %c0_8] : memref<16x128xf32, #tpu.memory_space<vmem>>, vector<1x128xf32>
    %c0_i32_9 = arith.constant 0 : i32
    %31 = arith.addi %0, %c0_i32_9 : i32
    %c5_i32 = arith.constant 5 : i32
    %32 = arith.addi %31, %c5_i32 : i32
    %33 = arith.index_cast %32 : i32 to index
    %34 = memref.load %arg1[%33] : memref<16xi32, #tpu.memory_space<smem>>
    %35 = arith.index_cast %34 : i32 to index
    %c0_10 = arith.constant 0 : index
    %36 = vector.load %arg2[%35, %c0_10] : memref<16x128xf32, #tpu.memory_space<vmem>>, vector<1x128xf32>
    %c0_i32_11 = arith.constant 0 : i32
    %37 = arith.addi %0, %c0_i32_11 : i32
    %c6_i32 = arith.constant 6 : i32
    %38 = arith.addi %37, %c6_i32 : i32
    %39 = arith.index_cast %38 : i32 to index
    %40 = memref.load %arg1[%39] : memref<16xi32, #tpu.memory_space<smem>>
    %41 = arith.index_cast %40 : i32 to index
    %c0_12 = arith.constant 0 : index
    %42 = vector.load %arg2[%41, %c0_12] : memref<16x128xf32, #tpu.memory_space<vmem>>, vector<1x128xf32>
    %c0_i32_13 = arith.constant 0 : i32
    %43 = arith.addi %0, %c0_i32_13 : i32
    %c7_i32 = arith.constant 7 : i32
    %44 = arith.addi %43, %c7_i32 : i32
    %45 = arith.index_cast %44 : i32 to index
    %46 = memref.load %arg1[%45] : memref<16xi32, #tpu.memory_space<smem>>
    %47 = arith.index_cast %46 : i32 to index
    %c0_14 = arith.constant 0 : index
    %48 = vector.load %arg2[%47, %c0_14] : memref<16x128xf32, #tpu.memory_space<vmem>>, vector<1x128xf32>
    %49 = tpu.concatenate %6, %12, %18, %24, %30, %36, %42, %48 in 0 : vector<1x128xf32>, vector<1x128xf32>, vector<1x128xf32>, vector<1x128xf32>, vector<1x128xf32>, vector<1x128xf32>, vector<1x128xf32>, vector<1x128xf32> -> vector<8x128xf32>
    %c0_15 = arith.constant 0 : index
    %c0_16 = arith.constant 0 : index
    %50 = vector.load %arg3[%c0_15, %c0_16] : memref<8x128xf32, #tpu.memory_space<vmem>>, vector<8x128xf32>
    tpu.vector_store %arg3[%c0_15, %c0_16], %49 {strides = array<i32>} : memref<8x128xf32, #tpu.memory_space<vmem>>, vector<8x128xf32>,
    return
  }
  func.func @transform_0(%arg0: i32, %arg1: memref<16xi32, #tpu.memory_space<smem>>) -> (i32, i32) {
    %c0_i32 = arith.constant 0 : i32
    %c0_i32_0 = arith.constant 0 : i32
    %c0_i32_1 = arith.constant 0 : i32
    return %c0_i32, %c0_i32_0 : i32, i32
  }
  func.func @transform_1(%arg0: i32, %arg1: memref<16xi32, #tpu.memory_space<smem>>) -> (i32, i32) {
    %c0_i32 = arith.constant 0 : i32
    %c0_i32_0 = arith.constant 0 : i32
    return %arg0, %c0_i32 : i32, i32
  }
}

</mosaic_0001>

<bundles_post_ra>
// kernel: tpu_custom_call.1
= control target key start
LH: loop header
LB: loop body
LE: loop exit
PB: predicated region body
PF: predicated region fallthrough
CT: control target
= control target key end

     0   :  { %s430_s9 = smov [#allocation3]   ;;  %s574_s0 = inlined_call_operand.hbm [shape: s32[16], index: 0, kind: input, shape index: {}]   ;;  %s575_s1 = inlined_call_operand.hbm [shape: f32[16,128], index: 1, kind: input, shape index: {}]   ;;  %s576_s2 = inlined_call_operand.hbm [shape: f32[16,128], index: 2, kind: output, shape index: {}]  }
   0x1   :  { %8 = dma.hbm_to_smem %s574_s0, 16, %s430_s9, [#allocation2] }
   0x2   :  { %404 = dma.done.wait [#allocation2], 16 }
   0x3   :  { %405 = vsyncadd [#allocation2], 4294967280 }
   0x4   :  { %10 = sfence }
   0x5   :  { %11 = vsyncpa [#allocation5], 0 }
   0x6   :  { %12 = vsyncpa [#allocation6], 0 }
   0x7   :  { %14 = vsyncpa [#allocation6 + $0x1], 0  ;;  %s453_s12 = smov 0   ;;  %s455_s13 = smov 0  }
   0x8   :  { %s457_s14 = smov 0   ;;  %s459_s15 = smov 0  }
   0x9 LB: > { %s474_s0 = sadd.s32 4294967295, %s428_s15   ;;  %s264_s16 = sadd.s32 4294967294, %s428_s15   ;;  %s428_s15 = sphi %s459_s15, %s584_s15   ;;  %s424_s14 = sphi %s457_s14, %s583_s14   ;;  %s420_s13 = sphi %s455_s13, %s582_s13   ;;  %s416_s12 = sphi %s453_s12, %s581_s12  }
   0xa   : > { %s478_s17 = sadd.s32 1, %s428_s15   ;;  %s48_s18 = sadd.s32 1, %s424_s14 }
   0xb   : > { %s45_s19 = ssub.s32 %s428_s15, %s478_s17  ;;  %p58_p0 = scmp.ne.s32.totalorder %s424_s14, %s420_s13 }
   0xc   : > { %p46_p1 = scmp.eq.s32.totalorder %s45_s19, 0  ;;  %p59_p2 = scmp.eq.s32.totalorder %s474_s0, 1 }
   0xd   : > { %p64_p3 = scmp.ne.s32.totalorder %s420_s13, %s416_s12  ;;  %p65_p4 = scmp.eq.s32.totalorder %s264_s16, 1 }
   0xe   : > { %s489_s20 = scalar_select %p46_p1, %s424_s14, %s48_s18  }
   0xf   : > { %p491_p5 = por %p59_p2, %p58_p0  ;;  %p495_p6 = por %p65_p4, %p64_p3 }
  0x10   : > { %p265_p7 = scmp.ge.s32.totalorder %s428_s15, 1  ;;  %p72_p8 = scmp.lt.s32.totalorder %s428_s15, 3 }
  0x11   : > { %s578_s22 = scalar_select %p495_p6, 1, 0 }
  0x12   : > { %p289_p9 = scmp.eq.s32.totalorder %s474_s0, 0  ;;  %p502_p10 = pnand %p265_p7, %p72_p8 }
  0x13   : > { %s431_s24 = smov [#allocation4]  }
  0x14   : > { %s84_s25 = sshll.u32 %s431_s24, 4  ;;  %p281_p11 = pneg %p502_p10  ;;  %s85_s25 = int_to_ptr.vmem [resolvable:$true] %s84_s25 }
  0x15   : > { %s347_s26 = scalar_lea.vmem %s85_s25, 256  ;;  %p355_p3 = scmp.lt.s32.totalorder %s85_s25, %s85_s25 }
  0x16   : > { %p282_p12 = pnand %p289_p9, %p281_p11  ;;  %p348_p0 = scmp.ne.s32.totalorder %s85_s25, %s347_s26 }
  0x17   : > { %p356_p4 = scmp.lt.s32.totalorder %s347_s26, %s347_s26 }
  0x18   : > { %p338_p13 = pneg %p282_p12 }
  0x19   : > { %p357_p6 = por %p356_p4, %p355_p3 }
  0x1a   : > { %p350_p1 = pnand %p348_p0, %p338_p13 }
  0x1c   : > { %p351_p2 = pneg %p350_p1 }
  0x1e   : > { %p358_p7 = pnand %p357_p6, %p351_p2 }
  0x20   : > { %361 = shalt.err (!%p358_p7)
}
  0x21   : > { %s432_s27 = smov 128   ;;  %s433_s28 = smov 8  }
  0x22   : > { %284 = dma.hbm_to_vmem [thread:$0]  (!%p282_p12), %s575_s1, 256, %s85_s25, [#allocation5], %s432_s27, %s432_s27, %s433_s28  }
  0x23   : > { %100 = sbr.rel (%p502_p10) target bundleno = 78 (0x4e), region = 24 }
  0x28   : > { %407 = dma.done.wait (%p289_p9), [#allocation5], 256  }
  0x29   : > { %409 = vsyncadd (%p289_p9), [#allocation5], 4294967040  ;;  %s112_s3 = sand.u32 1, %s420_s13   ;;  %s270_s4 = sshll.u32 %s474_s0, 3  ;;  %vm168_vm0 = vcmask 1040384   ;;  %vm170_vm1 = vcmask 1041408  }
  0x2a   : > { %s116_s5 = sld [smem:[#allocation3 + %s270_s4]]  ;;  %s523_s6 = sshll.u32 %s112_s3, 3  ;;  %vm172_vm2 = vcmask 1042432   ;;  %vm174_vm3 = vcmask 1043456   ;;  %vm176_vm4 = vcmask 1044480   ;;  %vm178_vm5 = vcmask 1045504  }
  0x2b   : > { %s119_s7 = sadd.s32 1, %s270_s4  ;;  %s123_s9 = sadd.s32 2, %s270_s4  ;;  %vm180_vm6 = vcmask 1046528  }
  0x2c   : > { %s120_s8 = sld [smem:[#allocation3 + %s119_s7]]  ;;  %s127_s11 = sadd.s32 3, %s270_s4 }
  0x2d   : > { %s124_s10 = sld [smem:[#allocation3 + %s123_s9]]  ;;  %s131_s18 = sadd.s32 4, %s270_s4 }
  0x2e   : > { %s128_s16 = sld [smem:[#allocation3 + %s127_s11]]  ;;  %s135_s23 = sadd.s32 5, %s270_s4 }
  0x2f   : > { %s132_s19 = sld [smem:[#allocation3 + %s131_s18]]  ;;  %s139_s25 = sadd.s32 6, %s270_s4 }
  0x30   : > { %s136_s24 = sld [smem:[#allocation3 + %s135_s23]]  ;;  %s143_s26 = sadd.s32 7, %s270_s4 }
  0x31   : > { %s525_s27 = sld [smem:[#allocation3 + %s139_s25]]  ;;  %s117_s28 = scalar_lea.vmem [#allocation4], %s116_s5 }
  0x32   : > { %v118_v0 = vld [vmem:[%s117_s28] sm:$0x1]  ;;  %s121_s29 = scalar_lea.vmem [#allocation4], %s120_s8  ;;  %s527_s30 = sld [smem:[#allocation3 + %s143_s26]] }
  0x33   : > { %v122_v1 = vld [vmem:[%s121_s29] sm:$0x1]  ;;  %s125_s7 = scalar_lea.vmem [#allocation4], %s124_s10  ;;  %s114_s8 = scalar_lea.vmem [#allocation7], %s523_s6 }
  0x34   : > { %v126_v2 = vld [vmem:[%s125_s7] sm:$0x1]  ;;  %v148_v3 = vrot.slane %v122_v1, 7  ;;  %s129_s9 = scalar_lea.vmem [#allocation4], %s128_s16  ;;  %s197_s10 = sshll.u32 %s114_s8, 4  ;;  %s534_s10 = int_to_ptr.vmem [resolvable:$true] %s197_s10 }
  0x35   : > { %v130_v4 = vld [vmem:[%s129_s9] sm:$0x1]  ;;  %v151_v5 = vrot.slane %v126_v2, 6  ;;  %s133_s4 = scalar_lea.vmem [#allocation4], %s132_s19  ;;  %s272_s16 = sshll.u32 %s474_s0, 7 }
  0x36   : > { %v134_v6 = vld [vmem:[%s133_s4] sm:$0x1]  ;;  %v154_v7 = vrot.slane %v130_v4, 5  ;;  %v169_v8 = vsel %vm168_vm0, %v118_v0, %v148_v3  ;;  %s137_s5 = scalar_lea.vmem [#allocation4], %s136_s24  ;;  %s195_s6 = scalar_lea.hbm %s576_s2, %s272_s16 }
  0x37   : > { %v138_v9 = vld [vmem:[%s137_s5] sm:$0x1]  ;;  %v157_v10 = vrot.slane %v134_v6, 4  ;;  %v171_v11 = vsel %vm170_vm1, %v169_v8, %v151_v5  ;;  %s141_s11 = scalar_lea.vmem [#allocation4], %s525_s27  ;;  %s184_s0 = scalar_lea.sflag [#allocation6], %s112_s3 }
  0x38   : > { %v160_v12 = vrot.slane %v138_v9, 3  ;;  %v173_v13 = vsel %vm172_vm2, %v171_v11, %v154_v7  ;;  %v142_v14 = vld [vmem:[%s141_s11] sm:$0x1]  ;;  %s145_s18 = scalar_lea.vmem [#allocation4], %s527_s30  ;;  %s362_s24 = scalar_lea.vmem %s534_s10, 128 }
  0x39   : > { %v175_v15 = vsel %vm174_vm3, %v173_v13, %v157_v10  ;;  %v146_v16 = vld [vmem:[%s145_s18] sm:$0x1]  ;;  %v163_v17 = vrot.slane %v142_v14, 2  ;;  %p363_p6 = scmp.ne.s32.totalorder %s534_s10, %s362_s24  ;;  %s434_s25 = smov [#allocation7]  }
  0x3a   : > { %v177_v18 = vsel %vm176_vm4, %v175_v15, %v160_v12  ;;  %v166_v19 = vrot.slane %v146_v16, 1  ;;  %s366_s26 = sshll.u32 %s434_s25, 4  ;;  %s367_s26 = int_to_ptr.vmem [resolvable:$false] %s366_s26 }
  0x3b   : > { %v179_v20 = vsel %vm178_vm5, %v177_v18, %v163_v17  ;;  %p364_p8 = pnand %p363_p6, %p491_p5  ;;  %s368_s27 = scalar_lea.vmem %s367_s26, 256 }
  0x3c   : > { %v181_v21 = vsel %vm180_vm6, %v179_v20, %v166_v19  ;;  %p369_p10 = scmp.lt.s32.totalorder %s534_s10, %s367_s26  ;;  %p370_p11 = scmp.lt.s32.totalorder %s368_s27, %s362_s24 }
  0x3d   : > { %182 = vst [vmem:[%s114_s8] sm:$0xff] %v181_v21  ;;  %p365_p9 = pneg %p364_p8 }
  0x3e   : > { %p371_p12 = por %p370_p11, %p369_p10 }
  0x40   : > { %p372_p13 = pnand %p371_p12, %p365_p9 }
  0x42   : > { %375 = shalt.err (!%p372_p13)
}
  0x43   : > { %s376_s28 = scalar_lea.hbm %s195_s6, 128  ;;  %s380_s30 = scalar_lea.hbm %s576_s2, 256 }
  0x44   : > { %p377_p0 = scmp.ne.s32.totalorder %s195_s6, %s376_s28  ;;  %p381_p3 = scmp.lt.s32.totalorder %s195_s6, %s576_s2 }
  0x45   : > { %p382_p4 = scmp.lt.s32.totalorder %s380_s30, %s376_s28 }
  0x46   : > { %p378_p1 = pnand %p377_p0, %p491_p5 }
  0x47   : > { %p383_p7 = por %p382_p4, %p381_p3 }
  0x48   : > { %p379_p2 = pneg %p378_p1 }
  0x4a   : > { %p384_p6 = pnand %p383_p7, %p379_p2 }
  0x4c   : > { %387 = shalt.err (!%p384_p6)
}
  0x4d   : > { %279 = dma.vmem_to_hbm [thread:$0]  (%p491_p5), %s534_s10, 128, %s195_s6, %s184_s0  }
  0x4e PF: > { %p291_p8 = scmp.ge.s32.totalorder %s428_s15, 2  ;;  %s209_s4 = sand.u32 1, %s416_s12  }
  0x4f   : > { %p580_p9 = scmp.ne.s32.totalorder %s578_s22, 0  ;;  %s210_s5 = scalar_lea.sflag [#allocation6], %s209_s4 }
  0x51   : > { %p286_p10 = pnand %p291_p8, %p580_p9 }
  0x53   : > { %p287_p11 = pneg %p286_p10 }
  0x55   : > { %411 = dma.done.wait (%p287_p11), %s210_s5, 128  }
  0x56   : > { %413 = vsyncadd (%p287_p11), %s210_s5, 4294967168  ;;  %p17_p12 = scmp.ge.s32.totalorder %s478_s17, 4   ;;  %s581_s12 = smov %s420_s13 }
  0x57   : > { %s582_s13 = smov %s424_s14  ;;  %s583_s14 = smov %s489_s20 }
  0x58   : > { %s584_s15 = smov %s478_s17  ;;  %19 = sbr.rel (!%p17_p12) target bundleno = 9 (0x9), region = 69 }
  0x5d   :  { %215 = vsyncpa [#allocation5], 1 }
  0x5e   :  { %217 = vsyncpa [#allocation5 + $0x1], 1 }
  0x5f   :  { %218 = vsyncpa [#allocation6], 1 }
  0x60   :  { %220 = vsyncpa [#allocation6 + $0x1], 1 }

</bundles_post_ra>
